<compile_context>
chip_gen: v6e
topology: v6e:2x2x1
jax: 0.10.0
libtpu: 0.0.40
codegen_flags: <defaults>
</compile_context>

<pallas_src>
import jax
import jax.numpy as jnp
from jax.experimental import pallas as pl
from jax.experimental.pallas import tpu as pltpu


_LANES = 128          # vreg lane width
_ACC_SUBLANES = 8     # f32 accumulator tile sublanes
_ROW_ALIGN = 32       # row padding alignment (covers f32/bf16/int8 tiling)
_NUM_PARTIALS = 2     # split across v7x's two TensorCores; harmless on 1-TC chips


def _round_up(x, m):
    return ((x + m - 1) // m) * m


def _avg_l1_kernel(pred_ref, targ_ref, out_ref):
    """Accumulates sum(|pred - targ|) per (sublane, lane) into out_ref.

    out_ref is an (8, 128) f32 block that stays resident across the
    "arbitrary" reduction axis, so it doubles as the accumulator.  The
    expensive cross-lane reduce is deferred to the wrapper.
    """
    i = pl.program_id(1)

    @pl.when(i == 0)
    def _init():
        out_ref[...] = jnp.zeros_like(out_ref)

    diff = jnp.abs(pred_ref[...].astype(jnp.float32) -
                   targ_ref[...].astype(jnp.float32))
    # Row-group reduction: (block_rows, 128) -> (block_rows//8, 8, 128) and sum
    # over the leading axis.  Pure vreg-wise VALU adds; no per-step XLU reduce.
    out_ref[...] += jnp.sum(diff.reshape(-1, _ACC_SUBLANES, _LANES), axis=0)


def avg_l1(pred, targ, *, block_rows=4096):
    """Average L1 loss between pred and targ (same shape, any rank) via Pallas."""
    assert pred.shape == targ.shape
    n = pred.size  # true (unpadded) element count

    # Lane-dense layout: rows of 128 lanes each.
    lane_rows = pl.cdiv(n, _LANES)
    per_core_rows = _round_up(pl.cdiv(lane_rows, _NUM_PARTIALS), _ROW_ALIGN)
    block_rows = max(_ROW_ALIGN, min(int(block_rows), per_core_rows))
    block_rows = _round_up(block_rows, _ROW_ALIGN)

    steps = pl.cdiv(lane_rows, _NUM_PARTIALS * block_rows)
    padded_rows = _NUM_PARTIALS * steps * block_rows
    pad = padded_rows * _LANES - n

    def to_slab(x):
        flat = x.reshape(-1)
        if pad:
            flat = jnp.pad(flat, (0, pad))  # zeros contribute 0 to the L1 sum
        return flat.reshape(padded_rows, _LANES)

    pred2d = to_slab(pred)
    targ2d = to_slab(targ)

    # 2 inputs x 2 pipeline buffers x block + slack; sized to fit every chip
    # generation (v5e 16 MiB scoped default, v7x 32 MiB scoped / 64 MiB phys).
    block_bytes = block_rows * _LANES * pred2d.dtype.itemsize
    vmem_limit = min(32 << 20, max(16 << 20, 4 * block_bytes + (4 << 20)))

    in_spec = pl.BlockSpec((block_rows, _LANES),
                           lambda c, i: (c * steps + i, 0))

    partials = pl.pallas_call(
        _avg_l1_kernel,
        out_shape=jax.ShapeDtypeStruct((_NUM_PARTIALS * _ACC_SUBLANES, _LANES),
                                       jnp.float32),
        grid_spec=pltpu.PrefetchScalarGridSpec(
            num_scalar_prefetch=0,
            grid=(_NUM_PARTIALS, steps),
            in_specs=[in_spec, in_spec],
            out_specs=pl.BlockSpec((_ACC_SUBLANES, _LANES),
                                   lambda c, i: (c, 0)),
        ),
        compiler_params=pltpu.CompilerParams(
            dimension_semantics=("parallel", "arbitrary"),
            vmem_limit_bytes=int(vmem_limit),
        ),
    )(pred2d, targ2d)

    # Single cheap cross-lane reduce over the 2*(8,128) partials, then mean.
    return jnp.sum(partials) * (1.0 / n)


class BaseModelPallas:
    """JAX/Pallas counterpart of the PyTorch BaseModel interface."""

    def __init__(self, pose_size, lr=1e-3):
        self.pose_size = pose_size
        self.lr = lr
        self.is_test = False
        self.loss_fun = avg_l1   # losses.avg_l1 equivalent (Pallas kernel)

    def create_model(self):
        # TODO(synk): abstract in the reference implementation.
        raise NotImplementedError("Must be implemented by subclass.")

    def forward(self, batch):
        # TODO(synk): abstract in the reference implementation.
        raise NotImplementedError("Must be implemented by subclass.")

    def backward(self, batch, model_out):
        # TODO(synk): abstract in the reference implementation.
        raise NotImplementedError("Must be implemented by subclass.")

    def model_name(self):
        return "{}-lr{}".format(self.__class__.__name__, self.lr)


if __name__ == "__main__":
    # Small deterministic AMASS-like batch: batch=2, seq=8, pose_size=64.
    B, S, P = 2, 8, 64
    key = jax.random.PRNGKey(0)
    kp, kt = jax.random.split(key)
    pred = jax.random.normal(kp, (B, S, P), dtype=jnp.float32)
    targ = jax.random.normal(kt, (B, S, P), dtype=jnp.float32)

    model = BaseModelPallas(pose_size=P)
    loss = model.loss_fun(pred, targ)
    loss = jax.block_until_ready(loss)

    # Silent sanity check against the pure-JAX reference.
    ref = jnp.mean(jnp.abs(pred - targ))
    assert jnp.allclose(loss, ref, rtol=1e-5, atol=1e-5), (loss, ref)

    print("KERNEL_OK")
</pallas_src>

<mosaic_0001>
module attributes {stable_mosaic.version = 11 : i64} {
  func.func @_avg_l1_kernel(%arg0: i32, %arg1: i32, %arg2: memref<32x128xf32, #tpu.memory_space<vmem>>, %arg3: memref<32x128xf32, #tpu.memory_space<vmem>>, %arg4: memref<8x128xf32, #tpu.memory_space<vmem>>) attributes {dimension_semantics = [#tpu.dimension_semantics<parallel>, #tpu.dimension_semantics<arbitrary>], iteration_bounds = array<i64: 2, 1>, scalar_prefetch = 0 : i64, scratch_operands = 0 : i64, tpu.core_type = #tpu.core_type<tc>, window_params = [{transform_indices = @transform_0, window_bounds = array<i64: 32, 128>}, {transform_indices = @transform_1, window_bounds = array<i64: 32, 128>}, {transform_indices = @transform_2, window_bounds = array<i64: 8, 128>}]} {
    %c0_i32 = arith.constant 0 : i32
    %0 = arith.cmpi eq, %arg1, %c0_i32 : i32
    %1 = arith.extui %0 : i1 to i32
    %c0_i32_0 = arith.constant 0 : i32
    %2 = arith.cmpi ne, %1, %c0_i32_0 : i32
    scf.if %2 {
      %cst_8 = arith.constant 0.000000e+00 : f32
      %12 = vector.broadcast %cst_8 : f32 to vector<8x128xf32>
      %c0_9 = arith.constant 0 : index
      %c0_10 = arith.constant 0 : index
      %13 = vector.load %arg4[%c0_9, %c0_10] : memref<8x128xf32, #tpu.memory_space<vmem>>, vector<8x128xf32>
      tpu.vector_store %arg4[%c0_9, %c0_10], %12 {strides = array<i32>} : memref<8x128xf32, #tpu.memory_space<vmem>>, vector<8x128xf32>,
    } else {
    }
    %c0 = arith.constant 0 : index
    %c0_1 = arith.constant 0 : index
    %3 = vector.load %arg2[%c0, %c0_1] : memref<32x128xf32, #tpu.memory_space<vmem>>, vector<32x128xf32>
    %c0_2 = arith.constant 0 : index
    %c0_3 = arith.constant 0 : index
    %4 = vector.load %arg3[%c0_2, %c0_3] : memref<32x128xf32, #tpu.memory_space<vmem>>, vector<32x128xf32>
    %5 = arith.subf %3, %4 : vector<32x128xf32>
    %6 = math.absf %5 : vector<32x128xf32>
    %c0_4 = arith.constant 0 : index
    %c0_5 = arith.constant 0 : index
    %7 = vector.load %arg4[%c0_4, %c0_5] : memref<8x128xf32, #tpu.memory_space<vmem>>, vector<8x128xf32>
    %8 = vector.shape_cast %6 : vector<32x128xf32> to vector<4x8x128xf32>
    %cst = arith.constant dense<0.000000e+00> : vector<8x128xf32>
    %9 = vector.multi_reduction <add>, %8, %cst [0] : vector<4x8x128xf32> to vector<8x128xf32>
    %10 = arith.addf %7, %9 : vector<8x128xf32>
    %c0_6 = arith.constant 0 : index
    %c0_7 = arith.constant 0 : index
    %11 = vector.load %arg4[%c0_6, %c0_7] : memref<8x128xf32, #tpu.memory_space<vmem>>, vector<8x128xf32>
    tpu.vector_store %arg4[%c0_6, %c0_7], %10 {strides = array<i32>} : memref<8x128xf32, #tpu.memory_space<vmem>>, vector<8x128xf32>,
    return
  }
  func.func @transform_0(%arg0: i32, %arg1: i32) -> (i32, i32) {
    %c1_i32 = arith.constant 1 : i32
    %0 = arith.muli %arg0, %c1_i32 : i32
    %1 = arith.addi %0, %arg1 : i32
    %c0_i32 = arith.constant 0 : i32
    %c0_i32_0 = arith.constant 0 : i32
    return %1, %c0_i32 : i32, i32
  }
  func.func @transform_1(%arg0: i32, %arg1: i32) -> (i32, i32) {
    %c1_i32 = arith.constant 1 : i32
    %0 = arith.muli %arg0, %c1_i32 : i32
    %1 = arith.addi %0, %arg1 : i32
    %c0_i32 = arith.constant 0 : i32
    %c0_i32_0 = arith.constant 0 : i32
    return %1, %c0_i32 : i32, i32
  }
  func.func @transform_2(%arg0: i32, %arg1: i32) -> (i32, i32) {
    %c0_i32 = arith.constant 0 : i32
    %c0_i32_0 = arith.constant 0 : i32
    return %arg0, %c0_i32 : i32, i32
  }
}

</mosaic_0001>

<bundles_post_ra>
// kernel: tpu_custom_call.1
= control target key start
LH: loop header
LB: loop body
LE: loop exit
PB: predicated region body
PF: predicated region fallthrough
CT: control target
= control target key end

     0   :  { %7 = vsyncpa [#allocation3], 0  ;;  %s788_s0 = inlined_call_operand.hbm [shape: f32[64,128], index: 0, kind: input, shape index: {}]   ;;  %s789_s1 = inlined_call_operand.hbm [shape: f32[64,128], index: 1, kind: input, shape index: {}]   ;;  %s790_s2 = inlined_call_operand.hbm [shape: f32[16,128], index: 2, kind: output, shape index: {}]  }
   0x1   :  { %9 = vsyncpa [#allocation3 + $0x1], 0 }
   0x2   :  { %10 = vsyncpa [#allocation6], 0 }
   0x3   :  { %12 = vsyncpa [#allocation6 + $0x1], 0 }
   0x4   :  { %13 = vsyncpa [#allocation4], 0 }
   0x5   :  { %15 = vsyncpa [#allocation4 + $0x1], 0  ;;  %s620_s9 = smov 0   ;;  %s622_s10 = smov 0  }
   0x6   :  { %s624_s11 = smov 0   ;;  %s626_s12 = smov 0  }
   0x7   :  { %s628_s13 = smov 0   ;;  %s630_s14 = smov 0  }
   0x8 LB: > { %s368_s15 = sadd.s32 4294967295, %s598_s14   ;;  %s369_s16 = sadd.s32 4294967294, %s598_s14   ;;  %s598_s14 = sphi %s630_s14, %s21_s14   ;;  %s594_s13 = sphi %s628_s13, %s802_s13   ;;  %s590_s12 = sphi %s626_s12, %s801_s12   ;;  %s586_s11 = sphi %s624_s11, %s800_s11   ;;  %s582_s10 = sphi %s622_s10, %s799_s10   ;;  %s578_s9 = sphi %s620_s9, %s798_s9  }
   0x9   : > { %s33_s17 = sadd.s32 1, %s594_s13  ;;  %s42_s18 = sadd.s32 1, %s586_s11 }
   0xa   : > { %p35_p0 = scmp.ge.s32.totalorder %s33_s17, 2  ;;  %p49_p1 = scmp.ne.s32.totalorder %s586_s11, %s582_s10 }
   0xb   : > { %p50_p2 = scmp.eq.s32.totalorder %s598_s14, 0  ;;  %p55_p3 = scmp.ne.s32.totalorder %s582_s10, %s578_s9 }
   0xc   : > { %s804_s17 = smov (%p35_p0, %s33_s17), 0  ;;  %p56_p5 = scmp.eq.s32.totalorder %s368_s15, 0 }
   0xd   : > { %p661_p4 = por %p50_p2, %p49_p1  ;;  %s39_s20 = ssub.s32 %s594_s13, %s804_s17 }
   0xe   : > { %p107_p6 = scmp.eq.s32.totalorder %s368_s15, 1  ;;  %p40_p7 = scmp.eq.s32.totalorder %s39_s20, 0 }
   0xf   : > { %p667_p8 = por %p56_p5, %p55_p3  ;;  %p113_p10 = scmp.eq.s32.totalorder %s369_s16, 1 }
  0x10   : > { %p671_p9 = por %p107_p6, %p49_p1  ;;  %p405_p13 = scmp.lt.s32.totalorder %s598_s14, 2 }
  0x11   : > { %s676_s23 = scalar_select %p40_p7, %s586_s11, %s42_s18  }
  0x12   : > { %p678_p11 = por %p113_p10, %p55_p3  ;;  %s685_s25 = sand.u32 1, %s586_s11  }
  0x13   : > { %s372_s26 = sshll.u32 %s685_s25, 5  ;;  %s386_s27 = sshll.u32 %s594_s13, 9 }
  0x14   : > { %s144_s30 = scalar_lea.hbm %s788_s0, %s386_s27  ;;  %s137_s3 = scalar_lea.vmem [#allocation2], %s372_s26 }
  0x15   : > { %s145_s4 = sshll.u32 %s137_s3, 4  ;;  %p698_p0 = pnand %p405_p13, %p661_p4  ;;  %s146_s4 = int_to_ptr.vmem [resolvable:$true] %s145_s4 }
  0x16   : > { %p378_p1 = scmp.ge.s32.totalorder %s598_s14, 1  ;;  %s134_s6 = scalar_lea.sflag [#allocation3], %s685_s25 }
  0x17   : > { %p460_p2 = pneg %p698_p0  ;;  %s471_s7 = scalar_lea.vmem %s146_s4, 512 }
  0x18   : > { %p472_p3 = scmp.ne.s32.totalorder %s146_s4, %s471_s7  ;;  %s600_s8 = smov [#allocation2]  }
  0x19   : > { %s476_s15 = sshll.u32 %s600_s8, 4  ;;  %s477_s15 = int_to_ptr.vmem [resolvable:$false] %s476_s15 }
  0x1a   : > { %p474_p5 = pnand %p472_p3, %p460_p2  ;;  %s478_s16 = scalar_lea.vmem %s477_s15, 1024 }
  0x1b   : > { %p479_p4 = scmp.lt.s32.totalorder %s146_s4, %s477_s15  ;;  %p480_p7 = scmp.lt.s32.totalorder %s478_s16, %s471_s7 }
  0x1c   : > { %p475_p6 = pneg %p474_p5 }
  0x1d   : > { %p481_p10 = por %p480_p7, %p479_p4 }
  0x1f   : > { %p482_p13 = pnand %p481_p10, %p475_p6 }
  0x21   : > { %485 = shalt.err (!%p482_p13)
}
  0x22   : > { %s601_s18 = smov 128   ;;  %s602_s19 = smov 8  }
  0x23   : > { %397 = dma.hbm_to_vmem [thread:$0]  (!%p698_p0), %s144_s30, 512, %s146_s4, %s134_s6, %s601_s18, %s601_s18, %s602_s19  }
  0x24   : > { %p175_p3 = scmp.lt.s32.totalorder %s598_s14, 3  ;;  %s166_s29 = scalar_lea.hbm %s789_s1, %s386_s27 }
  0x25   : > { %s159_s7 = scalar_lea.vmem [#allocation5], %s372_s26  ;;  %s156_s15 = scalar_lea.sflag [#allocation6], %s685_s25 }
  0x26   : > { %p719_p5 = pnand %p378_p1, %p175_p3  ;;  %s167_s8 = sshll.u32 %s159_s7, 4  ;;  %s168_s8 = int_to_ptr.vmem [resolvable:$true] %s167_s8 }
  0x27   : > { %s499_s16 = scalar_lea.vmem %s168_s8, 512  ;;  %s603_s30 = smov [#allocation5]  }
  0x28   : > { %p500_p6 = scmp.ne.s32.totalorder %s168_s8, %s499_s16  ;;  %s504_s4 = sshll.u32 %s603_s30, 4  ;;  %s505_s4 = int_to_ptr.vmem [resolvable:$false] %s504_s4 }
  0x29   : > { %s506_s27 = scalar_lea.vmem %s505_s4, 1024  ;;  %p507_p10 = scmp.lt.s32.totalorder %s168_s8, %s505_s4 }
  0x2a   : > { %p502_p4 = pnand %p500_p6, %p460_p2  ;;  %p508_p1 = scmp.lt.s32.totalorder %s506_s27, %s499_s16 }
  0x2c   : > { %p503_p7 = pneg %p502_p4  ;;  %p509_p13 = por %p508_p1, %p507_p10 }
  0x2e   : > { %p510_p3 = pnand %p509_p13, %p503_p7 }
  0x30   : > { %513 = shalt.err (!%p510_p3)
}
  0x31   : > { %400 = dma.hbm_to_vmem [thread:$0]  (!%p698_p0), %s166_s29, 512, %s168_s8, %s156_s15, %s601_s18, %s601_s18, %s602_s19  }
  0x32   : > { %179 = sbr.rel (%p719_p5) target bundleno = 84 (0x54), region = 28  ;;  %s734_s25 = sand.u32 (!%p719_p5), 1, %s582_s10  }
  0x33   : > { %s379_s26 = sshll.u32 (!%p719_p5), %s734_s25, 5  ;;  %s182_s6 = scalar_lea.sflag (!%p719_p5), [#allocation3], %s734_s25 }
  0x34   : > { %s185_s20 = scalar_lea.vmem (!%p719_p5), [#allocation2], %s379_s26 }
  0x37   : > { %565 = dma.done.wait (%p667_p8), %s182_s6, 512  }
  0x38   : > { %567 = vsyncadd (%p667_p8), %s182_s6, 4294966784  ;;  %s191_s5 = scalar_lea.sflag [#allocation6], %s734_s25  ;;  %s194_s18 = scalar_lea.vmem [#allocation5], %s379_s26 }
  0x39   : > { %569 = dma.done.wait (%p667_p8), %s191_s5, 512  }
  0x3a   : > { %571 = vsyncadd (%p667_p8), %s191_s5, 4294966784  ;;  %v229_v0 = vld [vmem:[%s185_s20] sm:$0xff]  ;;  %v230_v1 = vld [vmem:[%s185_s20 + $0x8] sm:$0xff]  ;;  %s381_s19 = sshll.u32 %s734_s25, 3  ;;  %s383_s21 = sshll.u32 %s590_s12, 7 }
  0x3b   : > { %v231_v2 = vld [vmem:[%s185_s20 + $0x10] sm:$0xff]  ;;  %v232_v3 = vld [vmem:[%s185_s20 + $0x18] sm:$0xff]  ;;  %v233_v4 = vld [vmem:[%s194_s18] sm:$0xff]  ;;  %s219_s28 = scalar_lea.vmem [#allocation7], %s381_s19  ;;  %s263_s8 = scalar_lea.hbm %s790_s2, %s383_s21 }
  0x3c   : > { %v234_v5 = vld [vmem:[%s194_s18 + $0x8] sm:$0xff]  ;;  %v235_v6 = vld [vmem:[%s194_s18 + $0x10] sm:$0xff]  ;;  %v236_v7 = vld [vmem:[%s194_s18 + $0x18] sm:$0xff]  ;;  %v237_v8 = vsub.f32 %v229_v0, %v233_v4  ;;  %s265_s29 = sshll.u32 %s219_s28, 4  ;;  %s252_s15 = scalar_lea.sflag [#allocation4], %s734_s25  ;;  %s266_s29 = int_to_ptr.vmem [resolvable:$true] %s265_s29 }
  0x3d   : > { %v238_v9 = vsub.f32 %v230_v1, %v234_v5  ;;  %v239_v10 = vsub.f32 %v231_v2, %v235_v6  ;;  %v240_v11 = vsub.f32 %v232_v3, %v236_v7  ;;  %s514_s16 = scalar_lea.vmem %s266_s29, 128  ;;  %s604_s30 = smov [#allocation7]  }
  0x3e   : > { %v241_v12 = vand.u32 2147483647, %v237_v8  ;;  %p515_p8 = scmp.ne.s32.totalorder %s266_s29, %s514_s16  ;;  %s518_s4 = sshll.u32 %s604_s30, 4  ;;  %s519_s4 = int_to_ptr.vmem [resolvable:$false] %s518_s4 }
  0x3f   : > { %v242_v13 = vand.u32 2147483647, %v238_v9  ;;  %v243_v14 = vand.u32 2147483647, %v239_v10  ;;  %v244_v15 = vand.u32 2147483647, %v240_v11  ;;  %p521_p5 = scmp.lt.s32.totalorder %s266_s29, %s519_s4 }
  0x40   : > { %p516_p0 = pnand %p515_p8, %p671_p9  ;;  %s520_s27 = scalar_lea.vmem %s519_s4, 256 }
  0x41   : > { %v246_v16 = vadd.f32 %v242_v13, %v241_v12  ;;  %p522_p6 = scmp.lt.s32.totalorder %s520_s27, %s514_s16 }
  0x42   : > { %p517_p2 = pneg %p516_p0 }
  0x43   : > { %v247_v17 = vadd.f32 %v246_v16, %v243_v14  ;;  %p523_p4 = por %p522_p6, %p521_p5 }
  0x45   : > { %v248_v18 = vadd.f32 %v247_v17, %v244_v15  ;;  %p524_p7 = pnand %p523_p4, %p517_p2 }
  0x47   : > { %250 = vst [vmem:[%s219_s28] sm:$0xff] %v248_v18 }
  0x48   : > { %527 = shalt.err (!%p524_p7)
}
  0x49   : > { %s528_s12 = scalar_lea.hbm %s263_s8, 128  ;;  %s532_s6 = scalar_lea.hbm %s790_s2, 256 }
  0x4a   : > { %p529_p10 = scmp.ne.s32.totalorder %s263_s8, %s528_s12  ;;  %p533_p3 = scmp.lt.s32.totalorder %s263_s8, %s790_s2 }
  0x4b   : > { %p534_p8 = scmp.lt.s32.totalorder %s532_s6, %s528_s12 }
  0x4c   : > { %p530_p1 = pnand %p529_p10, %p671_p9 }
  0x4d   : > { %p535_p0 = por %p534_p8, %p533_p3 }
  0x4e   : > { %p531_p13 = pneg %p530_p1 }
  0x50   : > { %p536_p12 = pnand %p535_p0, %p531_p13 }
  0x52   : > { %539 = shalt.err (!%p536_p12)
}
  0x53   : > { %392 = dma.vmem_to_hbm [thread:$0]  (%p671_p9), %s266_s29, 128, %s263_s8, %s252_s15  }
  0x54 PF: > { %s277_s18 = sand.u32 1, %s578_s9   ;;  %p797_p2 = scmp.ge.s32.totalorder %s598_s14, 2 }
  0x55   : > { %s278_s19 = scalar_lea.sflag [#allocation4], %s277_s18 }
  0x56   : > { %p402_p5 = pnand %p797_p2, %p678_p11 }
  0x58   : > { %p403_p6 = pneg %p402_p5 }
  0x5a   : > { %573 = dma.done.wait (%p403_p6), %s278_s19, 128  }
  0x5b   : > { %575 = vsyncadd (%p403_p6), %s278_s19, 4294967168  ;;  %s21_s14 = sadd.s32 1, %s598_s14   ;;  %s798_s9 = smov %s582_s10 }
  0x5c   : > { %p18_p4 = scmp.ge.s32.totalorder %s21_s14, 4   ;;  %s799_s10 = smov %s586_s11 }
  0x5d   : > { %s800_s11 = smov %s676_s23  ;;  %s801_s12 = smov %s594_s13 }
  0x5e   : > { %s802_s13 = smov %s804_s17  ;;  %20 = sbr.rel (!%p18_p4) target bundleno = 8 (0x8), region = 90 }
  0x63   :  { %283 = vsyncpa [#allocation3], 1 }
  0x64   :  { %285 = vsyncpa [#allocation3 + $0x1], 1 }
  0x65   :  { %286 = vsyncpa [#allocation6], 1 }
  0x66   :  { %288 = vsyncpa [#allocation6 + $0x1], 1 }
  0x67   :  { %289 = vsyncpa [#allocation4], 1 }
  0x68   :  { %291 = vsyncpa [#allocation4 + $0x1], 1 }

</bundles_post_ra>
